<compile_context>
chip_gen: v5e
topology: v5e:2x2
jax: 0.10.0
libtpu: 0.0.40
codegen_flags: <defaults>
</compile_context>

<pallas_src>
import functools

import jax
import jax.numpy as jnp
from jax import lax
from jax.experimental import pallas as pl
from jax.experimental.pallas import tpu as pltpu


def _attention_single_block_kernel(enc_ref, dec_ref, out_ref):
    # enc_ref: [S_enc, H], dec_ref: [S_dec, H], out_ref: [S_dec, H]
    enc = enc_ref[...]                      # input dtype (no up-cast for MXU)
    dec = dec_ref[...]
    # scores [S_dec, S_enc]: contract H of both operands directly (dot_general
    # contracting-dim choice is free on the MXU; no transposed intermediate).
    s = lax.dot_general(dec, enc, (((1,), (1,)), ((), ())),
                        preferred_element_type=jnp.float32)
    m = jnp.max(s, axis=-1, keepdims=True)          # lane-axis reduce (XLU)
    e = jnp.exp(s - m)                               # EUP
    l = jnp.sum(e, axis=-1, keepdims=True)
    acc = jnp.dot(e.astype(enc.dtype), enc, preferred_element_type=jnp.float32)
    inv_l = pl.reciprocal(l, approx=True)            # EUP, deferred normalize
    out_ref[...] = (acc * inv_l).astype(out_ref.dtype)


def _attention_online_kernel(enc_ref, dec_ref, out_ref, m_sc, l_sc, acc_sc,
                             *, s_enc, block_senc, needs_mask):
    # enc_ref: [block_senc, H], dec_ref: [S_dec, H], out_ref: [S_dec, H]
    k = pl.program_id(1)

    @pl.when(k == 0)
    def _init():
        m_sc[...] = jnp.full_like(m_sc, -jnp.inf)
        l_sc[...] = jnp.zeros_like(l_sc)
        acc_sc[...] = jnp.zeros_like(acc_sc)

    enc = enc_ref[...]          # [block_senc, H], input dtype (no up-cast)
    dec = dec_ref[...]          # [S_dec, H]

    if needs_mask:
        # Zero rows past the true S_enc so OOB garbage in a partial last block
        # can never inject inf/nan into either matmul.
        row = k * block_senc + lax.broadcasted_iota(jnp.int32, enc.shape, 0)
        enc = jnp.where(row < s_enc, enc, jnp.zeros_like(enc))

    # scores [S_dec, block_senc]: contract H of both operands directly.
    s = lax.dot_general(dec, enc, (((1,), (1,)), ((), ())),
                        preferred_element_type=jnp.float32)

    if needs_mask:
        col = k * block_senc + lax.broadcasted_iota(jnp.int32, s.shape, 1)
        s = jnp.where(col < s_enc, s, -jnp.inf)

    # Online (flash-style) softmax over the S_enc axis (lanes).
    m_prev = m_sc[...]                                        # [S_dec, 1]
    m_new = jnp.maximum(m_prev, jnp.max(s, axis=-1, keepdims=True))
    alpha = jnp.exp(m_prev - m_new)                           # [S_dec, 1]
    e = jnp.exp(s - m_new)                                    # [S_dec, block_senc]
    l_sc[...] = alpha * l_sc[...] + jnp.sum(e, axis=-1, keepdims=True)
    # Unnormalized accumulate; probabilities fed to the MXU in the input dtype.
    acc_sc[...] = alpha * acc_sc[...] + jnp.dot(
        e.astype(enc.dtype), enc, preferred_element_type=jnp.float32)
    m_sc[...] = m_new

    @pl.when(k == pl.num_programs(1) - 1)
    def _finalize():
        # Deferred normalization: one [S_dec, 1] reciprocal broadcast over H.
        inv_l = pl.reciprocal(l_sc[...], approx=True)
        out_ref[...] = (acc_sc[...] * inv_l).astype(out_ref.dtype)


def attention(enc_output: jax.Array, dec_output: jax.Array,
              *, block_senc: int = 512) -> jax.Array:
    """Pallas TPU implementation of the PyTorch Attention.forward."""
    B, S_enc, H = enc_output.shape
    Bd, S_dec, Hd = dec_output.shape
    assert B == Bd and H == Hd

    block_senc = min(block_senc, S_enc)
    if block_senc < S_enc:
        # Tiled path: sublane (second-to-last) block dim must be a multiple of 8.
        block_senc = ((block_senc + 7) // 8) * 8

    if block_senc >= S_enc:
        # Single-block fast path: no online-softmax machinery, no scratch.
        return pl.pallas_call(
            _attention_single_block_kernel,
            out_shape=jax.ShapeDtypeStruct((B, S_dec, H), enc_output.dtype),
            grid_spec=pltpu.PrefetchScalarGridSpec(
                num_scalar_prefetch=0,
                grid=(B,),
                in_specs=[
                    # None => squeezed leading batch dim: kernel sees 2-D refs.
                    pl.BlockSpec((None, S_enc, H), lambda b: (b, 0, 0)),
                    pl.BlockSpec((None, S_dec, H), lambda b: (b, 0, 0)),
                ],
                out_specs=pl.BlockSpec((None, S_dec, H), lambda b: (b, 0, 0)),
            ),
            compiler_params=pltpu.CompilerParams(
                dimension_semantics=("parallel",),
            ),
        )(enc_output, dec_output)

    num_k = pl.cdiv(S_enc, block_senc)
    needs_mask = (S_enc % block_senc) != 0

    kernel = functools.partial(
        _attention_online_kernel,
        s_enc=S_enc, block_senc=block_senc, needs_mask=needs_mask)

    return pl.pallas_call(
        kernel,
        out_shape=jax.ShapeDtypeStruct((B, S_dec, H), enc_output.dtype),
        grid_spec=pltpu.PrefetchScalarGridSpec(
            num_scalar_prefetch=0,
            grid=(B, num_k),
            in_specs=[
                pl.BlockSpec((None, block_senc, H), lambda b, k: (b, k, 0)),
                # dec block index is constant along k -> fetched once per batch.
                pl.BlockSpec((None, S_dec, H), lambda b, k: (b, 0, 0)),
            ],
            out_specs=pl.BlockSpec((None, S_dec, H), lambda b, k: (b, 0, 0)),
            scratch_shapes=[
                pltpu.VMEM((S_dec, 1), jnp.float32),   # running max m
                pltpu.VMEM((S_dec, 1), jnp.float32),   # running denom l
                pltpu.VMEM((S_dec, H), jnp.float32),   # unnormalized acc
            ],
        ),
        compiler_params=pltpu.CompilerParams(
            dimension_semantics=("parallel", "arbitrary"),
        ),
    )(enc_output, dec_output)


def _reference(enc_output, dec_output):
    # Pure-JAX reference mirroring the PyTorch code exactly.
    a_t = jnp.einsum("bsh,bth->bst", enc_output, dec_output)  # [B, S_enc, S_dec]
    a_t = jax.nn.softmax(a_t, axis=1)                          # softmax over S_enc
    c_t = jnp.einsum("bst,bsh->bth", a_t, enc_output)          # [B, S_dec, H]
    return c_t


if __name__ == "__main__":
    key = jax.random.PRNGKey(0)
    k1, k2, k3, k4, k5, k6 = jax.random.split(key, 6)

    # Small shapes consistent with the module (single-block fast path).
    B, S_enc, S_dec, H = 2, 16, 8, 32
    enc_output = jax.random.normal(k1, (B, S_enc, H), dtype=jnp.float32)
    dec_output = jax.random.normal(k2, (B, S_dec, H), dtype=jnp.float32)

    out = attention(enc_output, dec_output)
    jax.block_until_ready(out)

    ref = _reference(enc_output, dec_output)
    assert out.shape == (B, S_dec, H)
    # approx reciprocal => slightly looser tolerance than exact f32.
    assert jnp.allclose(out, ref, atol=1e-2, rtol=1e-2), "mismatch vs reference"

    # Multi-tile online-softmax path (3 S_enc tiles of 128, exact fit).
    B2, S_enc2, S_dec2, H2 = 2, 384, 16, 128
    enc2 = jax.random.normal(k3, (B2, S_enc2, H2), dtype=jnp.float32)
    dec2 = jax.random.normal(k4, (B2, S_dec2, H2), dtype=jnp.float32)
    out2 = attention(enc2, dec2, block_senc=128)
    jax.block_until_ready(out2)
    ref2 = _reference(enc2, dec2)
    assert jnp.allclose(out2, ref2, atol=1e-2, rtol=1e-2), "mismatch (tiled path)"

    # Multi-tile path with a ragged (masked) last S_enc tile.
    B3, S_enc3, S_dec3, H3 = 2, 200, 16, 128
    enc3 = jax.random.normal(k5, (B3, S_enc3, H3), dtype=jnp.float32)
    dec3 = jax.random.normal(k6, (B3, S_dec3, H3), dtype=jnp.float32)
    out3 = attention(enc3, dec3, block_senc=128)
    jax.block_until_ready(out3)
    ref3 = _reference(enc3, dec3)
    assert jnp.allclose(out3, ref3, atol=1e-2, rtol=1e-2), "mismatch (masked path)"

    print("KERNEL_OK")
</pallas_src>

<mosaic_0001>
module attributes {stable_mosaic.version = 11 : i64} {
  func.func @_attention_single_block_kernel(%arg0: i32, %arg1: memref<1x16x32xf32, #tpu.memory_space<vmem>>, %arg2: memref<1x8x32xf32, #tpu.memory_space<vmem>>, %arg3: memref<1x8x32xf32, #tpu.memory_space<vmem>>) attributes {dimension_semantics = [#tpu.dimension_semantics<parallel>], iteration_bounds = array<i64: 2>, scalar_prefetch = 0 : i64, scratch_operands = 0 : i64, tpu.core_type = #tpu.core_type<tc>, window_params = [{transform_indices = @transform_0, window_bounds = array<i64: 1, 16, 32>}, {transform_indices = @transform_1, window_bounds = array<i64: 1, 8, 32>}, {transform_indices = @transform_2, window_bounds = array<i64: 1, 8, 32>}]} {
    %c0 = arith.constant 0 : index
    %c0_0 = arith.constant 0 : index
    %c0_1 = arith.constant 0 : index
    %0 = vector.load %arg1[%c0, %c0_0, %c0_1] : memref<1x16x32xf32, #tpu.memory_space<vmem>>, vector<1x16x32xf32>
    %1 = vector.shape_cast %0 : vector<1x16x32xf32> to vector<16x32xf32>
    %c0_2 = arith.constant 0 : index
    %c0_3 = arith.constant 0 : index
    %c0_4 = arith.constant 0 : index
    %2 = vector.load %arg2[%c0_2, %c0_3, %c0_4] : memref<1x8x32xf32, #tpu.memory_space<vmem>>, vector<1x8x32xf32>
    %3 = vector.shape_cast %2 : vector<1x8x32xf32> to vector<8x32xf32>
    %cst = arith.constant dense<0.000000e+00> : vector<8x16xf32>
    %4 = tpu.matmul %3, %1, %cst {dimension_numbers = #tpu.dot_dimension_numbers<[1], [1], [0], [0], [0, 0, 1, 0], [], []>} : vector<8x32xf32>, vector<16x32xf32>, vector<8x16xf32> -> vector<8x16xf32>
    %cst_5 = arith.constant dense<0xFF800000> : vector<8xf32>
    %5 = vector.multi_reduction <maximumf>, %4, %cst_5 [1] : vector<8x16xf32> to vector<8xf32>
    %6 = vector.shape_cast %5 : vector<8xf32> to vector<8x1xf32>
    %7 = vector.broadcast %6 : vector<8x1xf32> to vector<8x16xf32>
    %8 = arith.subf %4, %7 : vector<8x16xf32>
    %9 = math.exp %8 : vector<8x16xf32>
    %cst_6 = arith.constant dense<0.000000e+00> : vector<8xf32>
    %10 = vector.multi_reduction <add>, %9, %cst_6 [1] : vector<8x16xf32> to vector<8xf32>
    %11 = vector.shape_cast %10 : vector<8xf32> to vector<8x1xf32>
    %cst_7 = arith.constant dense<0.000000e+00> : vector<8x32xf32>
    %12 = tpu.matmul %9, %1, %cst_7 {dimension_numbers = #tpu.dot_dimension_numbers<[1], [0], [0], [1], [0, 0, 1, 1], [], []>} : vector<8x16xf32>, vector<16x32xf32>, vector<8x32xf32> -> vector<8x32xf32>
    %13 = tpu.reciprocal %11 {approx = true} : vector<8x1xf32> -> vector<8x1xf32>
    %14 = vector.broadcast %13 : vector<8x1xf32> to vector<8x32xf32>
    %15 = arith.mulf %12, %14 : vector<8x32xf32>
    %c0_8 = arith.constant 0 : index
    %c0_9 = arith.constant 0 : index
    %c0_10 = arith.constant 0 : index
    %16 = vector.load %arg3[%c0_8, %c0_9, %c0_10] : memref<1x8x32xf32, #tpu.memory_space<vmem>>, vector<1x8x32xf32>
    %17 = vector.shape_cast %16 : vector<1x8x32xf32> to vector<8x32xf32>
    %18 = vector.shape_cast %15 : vector<8x32xf32> to vector<1x8x32xf32>
    tpu.vector_store %arg3[%c0_8, %c0_9, %c0_10], %18 {strides = array<i32>} : memref<1x8x32xf32, #tpu.memory_space<vmem>>, vector<1x8x32xf32>,
    return
  }
  func.func @transform_0(%arg0: i32) -> (i32, i32, i32) {
    %c0_i32 = arith.constant 0 : i32
    %c0_i32_0 = arith.constant 0 : i32
    %c0_i32_1 = arith.constant 0 : i32
    return %arg0, %c0_i32, %c0_i32_0 : i32, i32, i32
  }
  func.func @transform_1(%arg0: i32) -> (i32, i32, i32) {
    %c0_i32 = arith.constant 0 : i32
    %c0_i32_0 = arith.constant 0 : i32
    %c0_i32_1 = arith.constant 0 : i32
    return %arg0, %c0_i32, %c0_i32_0 : i32, i32, i32
  }
  func.func @transform_2(%arg0: i32) -> (i32, i32, i32) {
    %c0_i32 = arith.constant 0 : i32
    %c0_i32_0 = arith.constant 0 : i32
    %c0_i32_1 = arith.constant 0 : i32
    return %arg0, %c0_i32, %c0_i32_0 : i32, i32, i32
  }
}

</mosaic_0001>

<bundles_post_ra>
// kernel: tpu_custom_call.1
= control target key start
LH: loop header
LB: loop body
LE: loop exit
PB: predicated region body
PF: predicated region fallthrough
CT: control target
= control target key end

     0   :  { %7 = vsyncpa [#allocation3], 0  ;;  %s779_s0 = inlined_call_operand.hbm [shape: f32[2,16,32], index: 0, kind: input, shape index: {}]   ;;  %s780_s1 = inlined_call_operand.hbm [shape: f32[2,8,32], index: 1, kind: input, shape index: {}]   ;;  %s781_s2 = inlined_call_operand.hbm [shape: f32[2,8,32], index: 2, kind: output, shape index: {}]  }
   0x1   :  { %9 = vsyncpa [#allocation3 + $0x1], 0 }
   0x2   :  { %10 = vsyncpa [#allocation6], 0 }
   0x3   :  { %12 = vsyncpa [#allocation6 + $0x1], 0 }
   0x4   :  { %13 = vsyncpa [#allocation4], 0 }
   0x5   :  { %15 = vsyncpa [#allocation4 + $0x1], 0  ;;  %s608_s9 = smov 0   ;;  %s610_s10 = smov 0  }
   0x6   :  { %s612_s11 = smov 0   ;;  %s614_s12 = smov 0  }
   0x7 LB: > { %s629_s13 = sadd.s32 4294967295, %s589_s12   ;;  %s381_s14 = sadd.s32 4294967294, %s589_s12   ;;  %s589_s12 = sphi %s614_s12, %s792_s12   ;;  %s585_s11 = sphi %s612_s11, %s791_s11   ;;  %s581_s10 = sphi %s610_s10, %s790_s10   ;;  %s577_s9 = sphi %s608_s9, %s789_s9  }
   0x8   : > { %s633_s15 = sadd.s32 1, %s589_s12   ;;  %s28_s16 = sadd.s32 1, %s585_s11 }
   0x9   : > { %s25_s17 = ssub.s32 %s589_s12, %s633_s15  ;;  %p35_p0 = scmp.ne.s32.totalorder %s585_s11, %s581_s10 }
   0xa   : > { %p26_p1 = scmp.eq.s32.totalorder %s25_s17, 0  ;;  %p36_p2 = scmp.eq.s32.totalorder %s589_s12, 0 }
   0xb   : > { %p41_p3 = scmp.ne.s32.totalorder %s581_s10, %s577_s9  ;;  %p42_p4 = scmp.eq.s32.totalorder %s629_s13, 0 }
   0xc   : > { %s645_s18 = scalar_select %p26_p1, %s585_s11, %s28_s16  }
   0xd   : > { %p647_p5 = por %p36_p2, %p35_p0  ;;  %p651_p6 = por %p42_p4, %p41_p3 }
   0xe   : > { %p91_p7 = scmp.eq.s32.totalorder %s629_s13, 1  ;;  %p97_p8 = scmp.eq.s32.totalorder %s381_s14, 1 }
   0xf   : > { %p419_p10 = scmp.lt.s32.totalorder %s589_s12, 2  ;;  %s667_s23 = sand.u32 1, %s585_s11  }
  0x10   : > { %p658_p11 = por %p91_p7, %p35_p0  ;;  %p662_p12 = por %p97_p8, %p41_p3 }
  0x11   : > { %s401_s24 = sshll.u32 %s589_s12, 4  ;;  %s384_s25 = sshll.u32 %s667_s23, 4 }
  0x12   : > { %s126_s28 = scalar_lea.hbm %s779_s0, %s401_s24  ;;  %s121_s30 = scalar_lea.vmem [#allocation2], %s384_s25 }
  0x13   : > { %s127_s29 = sshll.u32 %s126_s28, 4  ;;  %s129_s3 = sshll.u32 %s121_s30, 4  ;;  %s128_s29 = int_to_ptr.hbm [resolvable:$true] %s127_s29  ;;  %s130_s3 = int_to_ptr.vmem [resolvable:$true] %s129_s3 }
  0x14   : > { %p676_p13 = pnand %p419_p10, %p647_p5  ;;  %p389_p0 = scmp.ge.s32.totalorder %s589_s12, 1 }
  0x15   : > { %p156_p1 = scmp.lt.s32.totalorder %s589_s12, 3  ;;  %s118_s5 = scalar_lea.sflag [#allocation3], %s667_s23 }
  0x16   : > { %s459_s6 = sshra.s32 %s128_s29, 4  ;;  %p463_p3 = pneg %p676_p13  ;;  %s460_s6 = int_to_ptr.hbm [resolvable:$true] %s459_s6 }
  0x17   : > { %s461_s7 = scalar_lea.hbm %s460_s6, 16  ;;  %s466_s16 = scalar_lea.hbm %s779_s0, 32 }
  0x18   : > { %p462_p2 = scmp.ne.s32.totalorder %s460_s6, %s461_s7  ;;  %p467_p5 = scmp.lt.s32.totalorder %s460_s6, %s779_s0 }
  0x19   : > { %p468_p8 = scmp.lt.s32.totalorder %s466_s16, %s461_s7 }
  0x1a   : > { %p464_p4 = pnand %p463_p3, %p462_p2 }
  0x1b   : > { %p469_p10 = por %p468_p8, %p467_p5 }
  0x1c   : > { %p465_p7 = pneg %p464_p4 }
  0x1e   : > { %p470_p9 = pnand %p469_p10, %p465_p7 }
  0x20   : > { %473 = shalt.err (!%p470_p9)
}
  0x21   : > { %s591_s24 = smov 128   ;;  %s592_s25 = smov 8  }
  0x22   : > { %411 = dma.hbm_to_vmem [thread:$0]  (!%p676_p13), %s128_s29, 256, %s130_s3, %s118_s5, %s591_s24, %s591_s24, %s592_s25  }
  0x23   : > { %p700_p2 = pnand %p389_p0, %p156_p1  ;;  %s387_s27 = sshll.u32 %s667_s23, 3 }
  0x24   : > { %s388_s28 = sshll.u32 %s589_s12, 3  ;;  %s143_s14 = scalar_lea.vmem [#allocation5], %s387_s27 }
  0x25   : > { %s147_s7 = scalar_lea.hbm %s780_s1, %s388_s28  ;;  %s151_s16 = sshll.u32 %s143_s14, 4  ;;  %s152_s16 = int_to_ptr.vmem [resolvable:$true] %s151_s16 }
  0x26   : > { %s149_s8 = sshll.u32 %s147_s7, 4  ;;  %s140_s17 = scalar_lea.sflag [#allocation6], %s667_s23  ;;  %s150_s8 = int_to_ptr.hbm [resolvable:$true] %s149_s8 }
  0x27   : > { %s489_s19 = sshra.s32 %s150_s8, 4  ;;  %s496_s24 = scalar_lea.hbm %s780_s1, 16  ;;  %s490_s19 = int_to_ptr.hbm [resolvable:$true] %s489_s19 }
  0x28   : > { %s491_s29 = scalar_lea.hbm %s490_s19, 8  ;;  %p497_p4 = scmp.lt.s32.totalorder %s490_s19, %s780_s1 }
  0x29   : > { %p492_p9 = scmp.ne.s32.totalorder %s490_s19, %s491_s29  ;;  %p498_p7 = scmp.lt.s32.totalorder %s496_s24, %s491_s29 }
  0x2b   : > { %p494_p0 = pnand %p492_p9, %p463_p3  ;;  %p499_p5 = por %p498_p7, %p497_p4 }
  0x2d   : > { %p495_p1 = pneg %p494_p0 }
  0x2f   : > { %p500_p8 = pnand %p499_p5, %p495_p1 }
  0x31   : > { %503 = shalt.err (!%p500_p8)
}
  0x32   : > { %414 = dma.hbm_to_vmem [thread:$0]  (!%p676_p13), %s150_s8, 128, %s152_s16, %s140_s17  }
  0x33   : > { %160 = sbr.rel (%p700_p2) target bundleno = 453 (0x1c5), region = 28  ;;  %s724_s23 = sand.u32 (!%p700_p2), 1, %s581_s10  }
  0x34   : > { %s390_s27 = sshll.u32 (!%p700_p2), %s724_s23, 4  ;;  %s163_s30 = scalar_lea.sflag (!%p700_p2), [#allocation3], %s724_s23 }
  0x35   : > { %s166_s6 = scalar_lea.vmem (!%p700_p2), [#allocation2], %s390_s27 }
  0x38   : > { %564 = dma.done.wait (%p651_p6), %s163_s30, 256  }
  0x39   : > { %566 = vsyncadd (%p651_p6), %s163_s30, 4294967040  ;;  %s391_s4 = sshll.u32 %s724_s23, 3  ;;  %s173_s26 = scalar_lea.sflag [#allocation6], %s724_s23 }
  0x3a   : > { %s176_s7 = scalar_lea.vmem [#allocation5], %s391_s4 }
  0x3b   : > { %568 = dma.done.wait (%p651_p6), %s173_s26, 128  }
  0x3c   : > { %570 = vsyncadd (%p651_p6), %s173_s26, 4294967168  ;;  %vm206_vm0 = vcmask 261120   ;;  %v204_v0 = vld [vmem:[%s166_s6 + $0x8] sm:$0xff]  ;;  %v203_v1 = vld [vmem:[%s166_s6] sm:$0xff]  ;;  %vm236_vm1 = vcmask 130048   ;;  %s398_s20 = sshll.u32 %s629_s13, 3 }
  0x3d   : > { %393 = vmatpush.xpose.msk.msra.mxu0 %vm206_vm0, %v204_v0  ;;  %263 = vmatpush.msra.mxu1 %v204_v0  ;;  %v205_v2 = vld [vmem:[%s176_s7] sm:$0xff]  ;;  %s283_s16 = scalar_lea.hbm %s781_s2, %s398_s20  ;;  %s202_s17 = scalar_lea.vmem [#allocation7], %s391_s4 }
  0x3e   : > { %s285_s19 = sshll.u32 %s202_s17, 4  ;;  %s287_s29 = sshll.u32 %s283_s16, 4  ;;  %s286_s19 = int_to_ptr.vmem [resolvable:$true] %s285_s19  ;;  %s288_s29 = int_to_ptr.hbm [resolvable:$true] %s287_s29 }
  0x3f   : > { %264 = vmatpush.msra.mxu1 %v203_v1  ;;  %s273_s3 = scalar_lea.sflag [#allocation4], %s724_s23  ;;  %s533_s5 = sshra.s32 %s288_s29, 4  ;;  %s534_s5 = int_to_ptr.hbm [resolvable:$true] %s533_s5 }
  0x40   : > { %s535_s13 = scalar_lea.hbm %s534_s5, 8  ;;  %s539_s28 = scalar_lea.hbm %s781_s2, 16 }
  0x41   : > { %394 = vmatpush.xpose.msk.msra.mxu0 %vm206_vm0, %v203_v1  ;;  %p536_p6 = scmp.ne.s32.totalorder %s534_s5, %s535_s13  ;;  %p540_p10 = scmp.lt.s32.totalorder %s534_s5, %s781_s2 }
  0x42   : > { %p541_p2 = scmp.lt.s32.totalorder %s539_s28, %s535_s13 }
  0x43   : > { %p537_p13 = pnand %p536_p6, %p658_p11 }
  0x44   : > { %395 = vmatmul.msk.f32.vlgmr.msra.gmra.mxu0 %vm206_vm0, %v205_v2  ;;  %p542_p9 = por %p541_p2, %p540_p10 }
  0x45   : > { %p538_p3 = pneg %p537_p13 }
  0x47   : > { %p543_p0 = pnand %p542_p9, %p538_p3 }
  0xc1   : > { %v233_v3 = vpop.f32.mrf.mxu0 }
  0xc2   : > { %v237_v4 = vsel %vm236_vm1, %v233_v3, -inf }
  0xc3   : > { %238 = vmax.xlane.f32.xlu0 %v237_v4 }
 0x136   : > { %v239_v5 = vpop.xlane.xlu0 %238 }
 0x137   : > { %v240_v6 = vsub.f32 %v233_v3, %v239_v5 }
 0x139   : > { %v241_v7 = vmul.f32 1.442695, %v240_v6 }
 0x13b   : > { %455 = vpow2.f32 %v241_v7 }
 0x141   : > { %v456_v8 = vpop.eup %455 }
 0x142   : > { %396 = vmatmul.msk.f32.vlgmr.msra.gmra.mxu1 %vm236_vm1, %v456_v8  ;;  %v243_v9 = vsel %vm236_vm1, %v456_v8, 0.0 }
 0x143   : > { %244 = vadd.xlane.f32.xlu0 %v243_v9 }
 0x1b6   : > { %v245_v10 = vpop.xlane.xlu0 %244 }
 0x1b7   : > { %457 = vrcp.f32 %v245_v10 }
 0x1bd   : > { %v458_v11 = vpop.eup %457 }
 0x1bf   : > { %v266_v12 = vpop.f32.mrf.mxu1 }
 0x1c0   : > { %v270_v13 = vmul.f32 %v458_v11, %v266_v12 }
 0x1c2   : > { %271 = vst.msk [vmem:[%s202_s17] sm:$0xff] %vm206_vm0, %v270_v13 }
 0x1c3   : > { %546 = shalt.err (!%p543_p0)
}
 0x1c4   : > { %406 = dma.vmem_to_hbm [thread:$0]  (%p658_p11), %s286_s19, 128, %s288_s29, %s273_s3  }
 0x1c5 PF: > { %s299_s23 = sand.u32 1, %s577_s9   ;;  %p788_p1 = scmp.ge.s32.totalorder %s589_s12, 2 }
 0x1c6   : > { %s300_s6 = scalar_lea.sflag [#allocation4], %s299_s23 }
 0x1c7   : > { %p416_p4 = pnand %p788_p1, %p662_p12 }
 0x1c9   : > { %p417_p7 = pneg %p416_p4 }
 0x1cb   : > { %572 = dma.done.wait (%p417_p7), %s300_s6, 128  }
 0x1cc   : > { %574 = vsyncadd (%p417_p7), %s300_s6, 4294967168  ;;  %p18_p5 = scmp.ge.s32.totalorder %s633_s15, 4   ;;  %s789_s9 = smov %s581_s10 }
 0x1cd   : > { %s790_s10 = smov %s585_s11  ;;  %s791_s11 = smov %s645_s18 }
 0x1ce   : > { %s792_s12 = smov %s633_s15  ;;  %20 = sbr.rel (!%p18_p5) target bundleno = 7 (0x7), region = 86 }
 0x1d3   :  { %306 = vsyncpa [#allocation3], 1 }
 0x1d4   :  { %308 = vsyncpa [#allocation3 + $0x1], 1 }
 0x1d5   :  { %309 = vsyncpa [#allocation6], 1 }
 0x1d6   :  { %311 = vsyncpa [#allocation6 + $0x1], 1 }
 0x1d7   :  { %312 = vsyncpa [#allocation4], 1 }
 0x1d8   :  { %314 = vsyncpa [#allocation4 + $0x1], 1 }

</bundles_post_ra>
